<compile_context>
chip_gen: v5e
topology: v5e:2x2
jax: 0.10.0
libtpu: 0.0.40
codegen_flags: <defaults>
</compile_context>

<pallas_src>
import math
import functools

import jax
import jax.numpy as jnp
from jax import lax
from jax.experimental import pallas as pl
from jax.experimental.pallas import tpu as pltpu

BN_EPS = 1e-5


def _conv_taps(x, w, *, cin, cout, hout, q):
    """(3,1) conv, H-pad=1, on the de-interleaved q-flattened layout.

    x: (2*cin, q) f32 — rows [0:cin] = even H rows, [cin:2*cin] = odd H rows,
       q = w*hout + t.
    w: (cout, 3*cin) f32 — w[co, kh*cin + ci] = conv_w[co, ci, kh, 0].
    Returns (acc_e, acc_o): (cout, q) f32 conv outputs for even / odd H rows.
    """
    f32 = jnp.float32
    t_idx = lax.broadcasted_iota(jnp.int32, (1, q), 1) % hout

    xe = x[:cin, :]            # even rows
    xo = x[cin:, :]            # odd rows
    # +-1 shifts along t as XLU lane rotations (jnp.roll semantics).  Lanes
    # with t==0 / t==hout-1 are exactly the H-boundary (zero-pad) taps AND the
    # only lanes the rotation wraps, so one mask handles both.
    x_prev = pltpu.roll(x, 1, 1)          # out[.., q] = in[.., q-1]
    x_next = pltpu.roll(x, q - 1, 1)      # out[.., q] = in[.., q+1]
    xo_prev = jnp.where(t_idx != 0, x_prev[cin:, :], 0.0)          # odd[t-1]
    xe_next = jnp.where(t_idx != hout - 1, x_next[:cin, :], 0.0)   # even[t+1]

    # Channel mix as VPU broadcast-FMA outer products (cout,1)x(1,q), no MXU.
    # Reused broadcasts (weight columns, xe/xo rows) are materialized once and
    # shared; single-use sources (xo_prev/xe_next) broadcast implicitly.
    acc_e = jnp.zeros((cout, q), f32)
    acc_o = jnp.zeros((cout, q), f32)
    for ci in range(cin):
        w0 = jnp.broadcast_to(w[:, ci:ci + 1], (cout, q))                 # kh=0
        w1 = jnp.broadcast_to(w[:, cin + ci:cin + ci + 1], (cout, q))     # kh=1
        w2 = jnp.broadcast_to(w[:, 2 * cin + ci:2 * cin + ci + 1],
                              (cout, q))                                  # kh=2
        se = jnp.broadcast_to(xe[ci:ci + 1, :], (cout, q))
        so = jnp.broadcast_to(xo[ci:ci + 1, :], (cout, q))
        # even output rows h=2t   : taps (odd[t-1], even[t], odd[t])
        # odd  output rows h=2t+1 : taps (even[t],  odd[t],  even[t+1])
        acc_e = acc_e + w0 * xo_prev[ci:ci + 1, :] + w1 * se + w2 * so
        acc_o = acc_o + w0 * se + w1 * so + w2 * xe_next[ci:ci + 1, :]
    return acc_e, acc_o


def _stats_kernel(x_ref, w_ref, sum_ref, sqs_ref, *, cin, cout, hout, q, nb):
    # x_ref: (nb, 2*cin, q)   one block of nb samples
    # w_ref: (cout, 3*cin)
    # sum_ref, sqs_ref: (cout, q) resident accumulator outputs (constant
    #                   index_map -> written back to HBM exactly once).
    @pl.when(pl.program_id(0) == 0)
    def _init():
        sum_ref[...] = jnp.zeros_like(sum_ref)
        sqs_ref[...] = jnp.zeros_like(sqs_ref)

    w = w_ref[...].astype(jnp.float32)
    for b in range(nb):
        acc_e, acc_o = _conv_taps(x_ref[b].astype(jnp.float32), w,
                                  cin=cin, cout=cout, hout=hout, q=q)
        # Per-lane partial sums only (plain VALU adds); the single cross-lane
        # reduction happens in the wrapper.
        sum_ref[...] += acc_e + acc_o
        sqs_ref[...] += acc_e * acc_e + acc_o * acc_o


def _apply_kernel(x_ref, w_ref, scale_ref, bias_ref, o_ref,
                  *, cin, cout, hout, q, nb):
    # scale_ref/bias_ref: (cout, 1) fused BN affine with the avg-pool 0.5
    # folded in (computed once in the wrapper).
    w = w_ref[...].astype(jnp.float32)
    scale = jnp.broadcast_to(scale_ref[...], (cout, q))   # hoisted broadcasts
    bias = jnp.broadcast_to(bias_ref[...], (cout, q))
    for b in range(nb):
        acc_e, acc_o = _conv_taps(x_ref[b].astype(jnp.float32), w,
                                  cin=cin, cout=cout, hout=hout, q=q)
        # 0.5*(relu(bn(e)) + relu(bn(o))) == relu(e*s+b) + relu(o*s+b)
        y = (jnp.maximum(acc_e * scale + bias, 0.0)
             + jnp.maximum(acc_o * scale + bias, 0.0))
        o_ref[b] = y.astype(o_ref.dtype)


def _pick_samples_per_block(n, cin, cout, q, vmem_block_budget_bytes):
    # Double-buffered (x block + out block) of the apply call must stay within
    # the budget; the stats call's footprint is strictly smaller.
    per_sample = (2 * cin + cout) * q * 4
    b_max = max(1, int(vmem_block_budget_bytes // (2 * per_sample)))
    b_max = min(b_max, n)
    for b in range(b_max, 0, -1):        # largest divisor of n: keeps the
        if n % b == 0:                   # batch stats exact (no ragged block)
            return b
    return 1


def conv_block_rms(x_nchw, conv_w_oihw, bn_gamma, bn_beta,
                   *, vmem_block_budget_bytes=24 * 1024 * 1024):
    """Forward pass of ConvBlock_rms (pool_type='avg', pool_size=(2,1))."""
    N, Cin, H, W = x_nchw.shape
    Cout = conv_w_oihw.shape[0]
    assert H % 2 == 0, "avg_pool2d((2,1)) assumes even H"
    Hout = H // 2
    Q = W * Hout   # lane axis; multiple of 128 -> dense vld/vst

    # --- wrapper-side layout plumbing (one fused XLA copy each way) ---------
    # De-interleave even/odd H rows, flatten (W, Hout) -> q = w*Hout + t, and
    # fold (parity, Cin) into one sublane axis.  No q padding.
    x_e = x_nchw[:, :, 0::2, :]                       # (N, Cin, Hout, W)
    x_o = x_nchw[:, :, 1::2, :]
    xd = jnp.stack([x_e, x_o], axis=1)                # (N, 2, Cin, Hout, W)
    xd = jnp.transpose(xd, (0, 1, 2, 4, 3))           # (N, 2, Cin, W, Hout)
    xd = xd.reshape(N, 2 * Cin, Q)                    # rows 0..Cin-1 = even

    # conv weight (Cout, Cin, 3, 1) -> (Cout, 3*Cin), column index kh*Cin+ci.
    w2 = jnp.transpose(conv_w_oihw[:, :, :, 0], (0, 2, 1)).reshape(Cout, 3 * Cin)
    w2 = w2.astype(jnp.float32)

    B = _pick_samples_per_block(N, Cin, Cout, Q, vmem_block_budget_bytes)
    n_blocks = N // B
    # ~48 MiB vmem limit is safe on v7x (64 MiB physical); v5e/v6e (128 MiB
    # physical) could raise it together with a bigger block budget.
    vmem_limit = 48 * 1024 * 1024

    # --- pass 1: per-channel, per-lane batch sum / sum-of-squares ----------
    stats_kernel = functools.partial(_stats_kernel, cin=Cin, cout=Cout,
                                     hout=Hout, q=Q, nb=B)
    psum, psqs = pl.pallas_call(
        stats_kernel,
        out_shape=(jax.ShapeDtypeStruct((Cout, Q), jnp.float32),
                   jax.ShapeDtypeStruct((Cout, Q), jnp.float32)),
        grid=(n_blocks,),
        in_specs=[
            pl.BlockSpec((B, 2 * Cin, Q), lambda s: (s, 0, 0)),
            pl.BlockSpec((Cout, 3 * Cin), lambda s: (0, 0)),
        ],
        # Resident accumulators: constant block index -> no per-step writeback.
        out_specs=(pl.BlockSpec((Cout, Q), lambda s: (0, 0)),
                   pl.BlockSpec((Cout, Q), lambda s: (0, 0))),
        compiler_params=pltpu.CompilerParams(
            dimension_semantics=("arbitrary",),
            vmem_limit_bytes=vmem_limit),
    )(xd, w2)

    # --- BN affine computed exactly once (tiny XLA ops on (Cout,) vectors) --
    count = float(N * H * W)
    mean = jnp.sum(psum, axis=1) / count                     # (Cout,)
    # TODO(synk): E[x^2]-E[x]^2 in f32 can cancel for badly-scaled inputs; an
    # exact mean-subtracted second pass would cost one more read of x.
    var = jnp.sum(psqs, axis=1) / count - mean * mean
    inv_std = lax.rsqrt(var + BN_EPS)
    g = bn_gamma.astype(jnp.float32)
    beta = bn_beta.astype(jnp.float32)
    scale = (0.5 * g * inv_std).reshape(Cout, 1)             # avg-pool 0.5 folded
    bias = (0.5 * (beta - mean * g * inv_std)).reshape(Cout, 1)

    # --- pass 2: conv + fused BN/ReLU/avg-pool epilogue ("parallel") --------
    apply_kernel = functools.partial(_apply_kernel, cin=Cin, cout=Cout,
                                     hout=Hout, q=Q, nb=B)
    out_flat = pl.pallas_call(
        apply_kernel,
        out_shape=jax.ShapeDtypeStruct((N, Cout, Q), x_nchw.dtype),
        grid=(n_blocks,),
        in_specs=[
            pl.BlockSpec((B, 2 * Cin, Q), lambda s: (s, 0, 0)),
            pl.BlockSpec((Cout, 3 * Cin), lambda s: (0, 0)),
            pl.BlockSpec((Cout, 1), lambda s: (0, 0)),
            pl.BlockSpec((Cout, 1), lambda s: (0, 0)),
        ],
        out_specs=pl.BlockSpec((B, Cout, Q), lambda s: (s, 0, 0)),
        compiler_params=pltpu.CompilerParams(
            dimension_semantics=("parallel",),    # megacore-shardable on v7x
            vmem_limit_bytes=vmem_limit),
    )(xd, w2, scale, bias)

    # (N, Cout, W, Hout) -> NCHW (N, Cout, Hout, W) to match PyTorch.
    return jnp.transpose(out_flat.reshape(N, Cout, W, Hout), (0, 1, 3, 2))


def _reference(x_nchw, conv_w_oihw, bn_gamma, bn_beta):
    """Pure-JAX reference mirroring the PyTorch forward (training-mode BN)."""
    y = lax.conv_general_dilated(
        x_nchw, conv_w_oihw, window_strides=(1, 1),
        padding=((1, 1), (0, 0)),
        dimension_numbers=("NCHW", "OIHW", "NCHW"))
    mean = jnp.mean(y, axis=(0, 2, 3), keepdims=True)
    var = jnp.mean((y - mean) ** 2, axis=(0, 2, 3), keepdims=True)
    y = (y - mean) / jnp.sqrt(var + BN_EPS)
    y = y * bn_gamma.reshape(1, -1, 1, 1) + bn_beta.reshape(1, -1, 1, 1)
    y = jnp.maximum(y, 0.0)
    n, c, h, w = y.shape
    return y.reshape(n, c, h // 2, 2, w).mean(axis=3)


if __name__ == "__main__":
    key = jax.random.PRNGKey(0)
    N, Cin, Cout, H, W = 2, 4, 8, 16, 16

    kx, kw = jax.random.split(key)
    x = jax.random.normal(kx, (N, Cin, H, W), dtype=jnp.float32)

    # init_layer(): uniform(-scale, scale), n = Cin*3*1, scale = sqrt(2/n)*sqrt(3)
    n_fan = Cin * 3 * 1
    scale = math.sqrt(2.0 / n_fan) * math.sqrt(3.0)
    conv_w = jax.random.uniform(kw, (Cout, Cin, 3, 1), dtype=jnp.float32,
                                minval=-scale, maxval=scale)
    bn_gamma = jnp.ones((Cout,), dtype=jnp.float32)   # init_bn(): weight = 1
    bn_beta = jnp.zeros((Cout,), dtype=jnp.float32)   # init_bn(): bias = 0

    out = jax.block_until_ready(conv_block_rms(x, conv_w, bn_gamma, bn_beta))
    ref = jax.block_until_ready(_reference(x, conv_w, bn_gamma, bn_beta))

    assert out.shape == (N, Cout, H // 2, W), out.shape
    assert jnp.allclose(out, ref, rtol=1e-3, atol=1e-3), "mismatch vs reference"

    print("KERNEL_OK")
</pallas_src>

<mosaic_0001>
module attributes {stable_mosaic.version = 11 : i64} {
  func.func @_stats_kernel(%arg0: i32, %arg1: memref<2x8x128xf32, #tpu.memory_space<vmem>>, %arg2: memref<8x12xf32, #tpu.memory_space<vmem>>, %arg3: memref<8x128xf32, #tpu.memory_space<vmem>>, %arg4: memref<8x128xf32, #tpu.memory_space<vmem>>) attributes {dimension_semantics = [#tpu.dimension_semantics<arbitrary>], iteration_bounds = array<i64: 1>, scalar_prefetch = 0 : i64, scratch_operands = 0 : i64, tpu.core_type = #tpu.core_type<tc>, window_params = [{transform_indices = @transform_0, window_bounds = array<i64: 2, 8, 128>}, {pipeline_mode = #tpu.pipeline_mode<synchronous>, transform_indices = @transform_1, window_bounds = array<i64: 8, 12>}, {pipeline_mode = #tpu.pipeline_mode<synchronous>, transform_indices = @transform_2, window_bounds = array<i64: 8, 128>}, {pipeline_mode = #tpu.pipeline_mode<synchronous>, transform_indices = @transform_3, window_bounds = array<i64: 8, 128>}]} {
    %c0_i32 = arith.constant 0 : i32
    %0 = arith.cmpi eq, %arg0, %c0_i32 : i32
    %1 = arith.extui %0 : i1 to i32
    %c0_i32_0 = arith.constant 0 : i32
    %2 = arith.cmpi ne, %1, %c0_i32_0 : i32
    scf.if %2 {
      %cst_46 = arith.constant 0.000000e+00 : f32
      %350 = vector.broadcast %cst_46 : f32 to vector<8x128xf32>
      %c0_47 = arith.constant 0 : index
      %c0_48 = arith.constant 0 : index
      %351 = vector.load %arg3[%c0_47, %c0_48] : memref<8x128xf32, #tpu.memory_space<vmem>>, vector<8x128xf32>
      tpu.vector_store %arg3[%c0_47, %c0_48], %350 {strides = array<i32>} : memref<8x128xf32, #tpu.memory_space<vmem>>, vector<8x128xf32>,
      %cst_49 = arith.constant 0.000000e+00 : f32
      %352 = vector.broadcast %cst_49 : f32 to vector<8x128xf32>
      %c0_50 = arith.constant 0 : index
      %c0_51 = arith.constant 0 : index
      %353 = vector.load %arg4[%c0_50, %c0_51] : memref<8x128xf32, #tpu.memory_space<vmem>>, vector<8x128xf32>
      tpu.vector_store %arg4[%c0_50, %c0_51], %352 {strides = array<i32>} : memref<8x128xf32, #tpu.memory_space<vmem>>, vector<8x128xf32>,
    } else {
    }
    %c0 = arith.constant 0 : index
    %c0_1 = arith.constant 0 : index
    %3 = vector.load %arg2[%c0, %c0_1] : memref<8x12xf32, #tpu.memory_space<vmem>>, vector<8x12xf32>
    %c0_2 = arith.constant 0 : index
    %c0_3 = arith.constant 0 : index
    %c0_4 = arith.constant 0 : index
    %4 = vector.load %arg1[%c0_2, %c0_3, %c0_4] : memref<2x8x128xf32, #tpu.memory_space<vmem>>, vector<1x8x128xf32>
    %5 = vector.shape_cast %4 : vector<1x8x128xf32> to vector<8x128xf32>
    %6 = tpu.iota {dimensions = array<i32: 1>} : vector<1x128xi32>
    %c8_i32 = arith.constant 8 : i32
    %c0_i32_5 = arith.constant 0 : i32
    %7 = arith.cmpi eq, %c8_i32, %c0_i32_5 : i32
    %c1_i32 = arith.constant 1 : i32
    %8 = arith.select %7, %c1_i32, %c8_i32 : i32
    %9 = vector.broadcast %8 : i32 to vector<1x128xi32>
    %10 = arith.remsi %6, %9 : vector<1x128xi32>
    %c0_i32_6 = arith.constant 0 : i32
    %11 = vector.broadcast %c0_i32_6 : i32 to vector<1x128xi32>
    %12 = arith.cmpi ne, %10, %11 : vector<1x128xi32>
    %c0_i32_7 = arith.constant 0 : i32
    %13 = vector.broadcast %c0_i32_7 : i32 to vector<1x128xi32>
    %14 = arith.cmpi slt, %10, %13 : vector<1x128xi32>
    %c0_i32_8 = arith.constant 0 : i32
    %15 = arith.cmpi slt, %8, %c0_i32_8 : i32
    %16 = vector.broadcast %15 : i1 to vector<1x128xi1>
    %17 = vector.broadcast %16 : vector<1x128xi1> to vector<1x128xi1>
    %18 = arith.xori %14, %17 : vector<1x128xi1>
    %19 = arith.andi %18, %12 : vector<1x128xi1>
    %20 = vector.broadcast %8 : i32 to vector<1x128xi32>
    %21 = arith.addi %10, %20 : vector<1x128xi32>
    %22 = arith.select %19, %21, %10 : vector<1x128xi1>, vector<1x128xi32>
    %23 = vector.extract_strided_slice %5 {offsets = [0, 0], sizes = [4, 128], strides = [1, 1]} : vector<8x128xf32> to vector<4x128xf32>
    %24 = vector.extract_strided_slice %5 {offsets = [4, 0], sizes = [4, 128], strides = [1, 1]} : vector<8x128xf32> to vector<4x128xf32>
    %c1_i32_9 = arith.constant 1 : i32
    %25 = tpu.dynamic_rotate %5 by %c1_i32_9 dim 1 : vector<8x128xf32>, i32 -> vector<8x128xf32>
    %c127_i32 = arith.constant 127 : i32
    %26 = tpu.dynamic_rotate %5 by %c127_i32 dim 1 : vector<8x128xf32>, i32 -> vector<8x128xf32>
    %c0_i32_10 = arith.constant 0 : i32
    %27 = vector.broadcast %c0_i32_10 : i32 to vector<1x128xi32>
    %28 = arith.cmpi ne, %22, %27 : vector<1x128xi32>
    %29 = vector.extract_strided_slice %25 {offsets = [4, 0], sizes = [4, 128], strides = [1, 1]} : vector<8x128xf32> to vector<4x128xf32>
    %cst = arith.constant 0.000000e+00 : f32
    %30 = vector.shape_cast %28 : vector<1x128xi1> to vector<1x128xi1>
    %31 = vector.broadcast %30 : vector<1x128xi1> to vector<4x128xi1>
    %32 = vector.broadcast %cst : f32 to vector<4x128xf32>
    %33 = arith.select %31, %29, %32 : vector<4x128xi1>, vector<4x128xf32>
    %c7_i32 = arith.constant 7 : i32
    %34 = vector.broadcast %c7_i32 : i32 to vector<1x128xi32>
    %35 = arith.cmpi ne, %22, %34 : vector<1x128xi32>
    %36 = vector.extract_strided_slice %26 {offsets = [0, 0], sizes = [4, 128], strides = [1, 1]} : vector<8x128xf32> to vector<4x128xf32>
    %cst_11 = arith.constant 0.000000e+00 : f32
    %37 = vector.shape_cast %35 : vector<1x128xi1> to vector<1x128xi1>
    %38 = vector.broadcast %37 : vector<1x128xi1> to vector<4x128xi1>
    %39 = vector.broadcast %cst_11 : f32 to vector<4x128xf32>
    %40 = arith.select %38, %36, %39 : vector<4x128xi1>, vector<4x128xf32>
    %cst_12 = arith.constant 0.000000e+00 : f32
    %41 = vector.broadcast %cst_12 : f32 to vector<8x128xf32>
    %cst_13 = arith.constant 0.000000e+00 : f32
    %42 = vector.broadcast %cst_13 : f32 to vector<8x128xf32>
    %43 = vector.extract_strided_slice %3 {offsets = [0, 0], sizes = [8, 1], strides = [1, 1]} : vector<8x12xf32> to vector<8x1xf32>
    %44 = vector.shape_cast %43 : vector<8x1xf32> to vector<8x1xf32>
    %45 = vector.broadcast %44 : vector<8x1xf32> to vector<8x128xf32>
    %46 = vector.extract_strided_slice %3 {offsets = [0, 4], sizes = [8, 1], strides = [1, 1]} : vector<8x12xf32> to vector<8x1xf32>
    %47 = vector.shape_cast %46 : vector<8x1xf32> to vector<8x1xf32>
    %48 = vector.broadcast %47 : vector<8x1xf32> to vector<8x128xf32>
    %49 = vector.extract_strided_slice %3 {offsets = [0, 8], sizes = [8, 1], strides = [1, 1]} : vector<8x12xf32> to vector<8x1xf32>
    %50 = vector.shape_cast %49 : vector<8x1xf32> to vector<8x1xf32>
    %51 = vector.broadcast %50 : vector<8x1xf32> to vector<8x128xf32>
    %52 = vector.extract_strided_slice %23 {offsets = [0, 0], sizes = [1, 128], strides = [1, 1]} : vector<4x128xf32> to vector<1x128xf32>
    %53 = vector.shape_cast %52 : vector<1x128xf32> to vector<1x128xf32>
    %54 = vector.broadcast %53 : vector<1x128xf32> to vector<8x128xf32>
    %55 = vector.extract_strided_slice %24 {offsets = [0, 0], sizes = [1, 128], strides = [1, 1]} : vector<4x128xf32> to vector<1x128xf32>
    %56 = vector.shape_cast %55 : vector<1x128xf32> to vector<1x128xf32>
    %57 = vector.broadcast %56 : vector<1x128xf32> to vector<8x128xf32>
    %58 = vector.extract_strided_slice %33 {offsets = [0, 0], sizes = [1, 128], strides = [1, 1]} : vector<4x128xf32> to vector<1x128xf32>
    %59 = vector.broadcast %58 : vector<1x128xf32> to vector<8x128xf32>
    %60 = arith.mulf %45, %59 : vector<8x128xf32>
    %61 = arith.addf %41, %60 : vector<8x128xf32>
    %62 = arith.mulf %48, %54 : vector<8x128xf32>
    %63 = arith.addf %61, %62 : vector<8x128xf32>
    %64 = arith.mulf %51, %57 : vector<8x128xf32>
    %65 = arith.addf %63, %64 : vector<8x128xf32>
    %66 = arith.mulf %45, %54 : vector<8x128xf32>
    %67 = arith.addf %42, %66 : vector<8x128xf32>
    %68 = arith.mulf %48, %57 : vector<8x128xf32>
    %69 = arith.addf %67, %68 : vector<8x128xf32>
    %70 = vector.extract_strided_slice %40 {offsets = [0, 0], sizes = [1, 128], strides = [1, 1]} : vector<4x128xf32> to vector<1x128xf32>
    %71 = vector.broadcast %70 : vector<1x128xf32> to vector<8x128xf32>
    %72 = arith.mulf %51, %71 : vector<8x128xf32>
    %73 = arith.addf %69, %72 : vector<8x128xf32>
    %74 = vector.extract_strided_slice %3 {offsets = [0, 1], sizes = [8, 1], strides = [1, 1]} : vector<8x12xf32> to vector<8x1xf32>
    %75 = vector.shape_cast %74 : vector<8x1xf32> to vector<8x1xf32>
    %76 = vector.broadcast %75 : vector<8x1xf32> to vector<8x128xf32>
    %77 = vector.extract_strided_slice %3 {offsets = [0, 5], sizes = [8, 1], strides = [1, 1]} : vector<8x12xf32> to vector<8x1xf32>
    %78 = vector.shape_cast %77 : vector<8x1xf32> to vector<8x1xf32>
    %79 = vector.broadcast %78 : vector<8x1xf32> to vector<8x128xf32>
    %80 = vector.extract_strided_slice %3 {offsets = [0, 9], sizes = [8, 1], strides = [1, 1]} : vector<8x12xf32> to vector<8x1xf32>
    %81 = vector.shape_cast %80 : vector<8x1xf32> to vector<8x1xf32>
    %82 = vector.broadcast %81 : vector<8x1xf32> to vector<8x128xf32>
    %83 = vector.extract_strided_slice %23 {offsets = [1, 0], sizes = [1, 128], strides = [1, 1]} : vector<4x128xf32> to vector<1x128xf32>
    %84 = vector.shape_cast %83 : vector<1x128xf32> to vector<1x128xf32>
    %85 = vector.broadcast %84 : vector<1x128xf32> to vector<8x128xf32>
    %86 = vector.extract_strided_slice %24 {offsets = [1, 0], sizes = [1, 128], strides = [1, 1]} : vector<4x128xf32> to vector<1x128xf32>
    %87 = vector.shape_cast %86 : vector<1x128xf32> to vector<1x128xf32>
    %88 = vector.broadcast %87 : vector<1x128xf32> to vector<8x128xf32>
    %89 = vector.extract_strided_slice %33 {offsets = [1, 0], sizes = [1, 128], strides = [1, 1]} : vector<4x128xf32> to vector<1x128xf32>
    %90 = vector.broadcast %89 : vector<1x128xf32> to vector<8x128xf32>
    %91 = arith.mulf %76, %90 : vector<8x128xf32>
    %92 = arith.addf %65, %91 : vector<8x128xf32>
    %93 = arith.mulf %79, %85 : vector<8x128xf32>
    %94 = arith.addf %92, %93 : vector<8x128xf32>
    %95 = arith.mulf %82, %88 : vector<8x128xf32>
    %96 = arith.addf %94, %95 : vector<8x128xf32>
    %97 = arith.mulf %76, %85 : vector<8x128xf32>
    %98 = arith.addf %73, %97 : vector<8x128xf32>
    %99 = arith.mulf %79, %88 : vector<8x128xf32>
    %100 = arith.addf %98, %99 : vector<8x128xf32>
    %101 = vector.extract_strided_slice %40 {offsets = [1, 0], sizes = [1, 128], strides = [1, 1]} : vector<4x128xf32> to vector<1x128xf32>
    %102 = vector.broadcast %101 : vector<1x128xf32> to vector<8x128xf32>
    %103 = arith.mulf %82, %102 : vector<8x128xf32>
    %104 = arith.addf %100, %103 : vector<8x128xf32>
    %105 = vector.extract_strided_slice %3 {offsets = [0, 2], sizes = [8, 1], strides = [1, 1]} : vector<8x12xf32> to vector<8x1xf32>
    %106 = vector.shape_cast %105 : vector<8x1xf32> to vector<8x1xf32>
    %107 = vector.broadcast %106 : vector<8x1xf32> to vector<8x128xf32>
    %108 = vector.extract_strided_slice %3 {offsets = [0, 6], sizes = [8, 1], strides = [1, 1]} : vector<8x12xf32> to vector<8x1xf32>
    %109 = vector.shape_cast %108 : vector<8x1xf32> to vector<8x1xf32>
    %110 = vector.broadcast %109 : vector<8x1xf32> to vector<8x128xf32>
    %111 = vector.extract_strided_slice %3 {offsets = [0, 10], sizes = [8, 1], strides = [1, 1]} : vector<8x12xf32> to vector<8x1xf32>
    %112 = vector.shape_cast %111 : vector<8x1xf32> to vector<8x1xf32>
    %113 = vector.broadcast %112 : vector<8x1xf32> to vector<8x128xf32>
    %114 = vector.extract_strided_slice %23 {offsets = [2, 0], sizes = [1, 128], strides = [1, 1]} : vector<4x128xf32> to vector<1x128xf32>
    %115 = vector.shape_cast %114 : vector<1x128xf32> to vector<1x128xf32>
    %116 = vector.broadcast %115 : vector<1x128xf32> to vector<8x128xf32>
    %117 = vector.extract_strided_slice %24 {offsets = [2, 0], sizes = [1, 128], strides = [1, 1]} : vector<4x128xf32> to vector<1x128xf32>
    %118 = vector.shape_cast %117 : vector<1x128xf32> to vector<1x128xf32>
    %119 = vector.broadcast %118 : vector<1x128xf32> to vector<8x128xf32>
    %120 = vector.extract_strided_slice %33 {offsets = [2, 0], sizes = [1, 128], strides = [1, 1]} : vector<4x128xf32> to vector<1x128xf32>
    %121 = vector.broadcast %120 : vector<1x128xf32> to vector<8x128xf32>
    %122 = arith.mulf %107, %121 : vector<8x128xf32>
    %123 = arith.addf %96, %122 : vector<8x128xf32>
    %124 = arith.mulf %110, %116 : vector<8x128xf32>
    %125 = arith.addf %123, %124 : vector<8x128xf32>
    %126 = arith.mulf %113, %119 : vector<8x128xf32>
    %127 = arith.addf %125, %126 : vector<8x128xf32>
    %128 = arith.mulf %107, %116 : vector<8x128xf32>
    %129 = arith.addf %104, %128 : vector<8x128xf32>
    %130 = arith.mulf %110, %119 : vector<8x128xf32>
    %131 = arith.addf %129, %130 : vector<8x128xf32>
    %132 = vector.extract_strided_slice %40 {offsets = [2, 0], sizes = [1, 128], strides = [1, 1]} : vector<4x128xf32> to vector<1x128xf32>
    %133 = vector.broadcast %132 : vector<1x128xf32> to vector<8x128xf32>
    %134 = arith.mulf %113, %133 : vector<8x128xf32>
    %135 = arith.addf %131, %134 : vector<8x128xf32>
    %136 = vector.extract_strided_slice %3 {offsets = [0, 3], sizes = [8, 1], strides = [1, 1]} : vector<8x12xf32> to vector<8x1xf32>
    %137 = vector.shape_cast %136 : vector<8x1xf32> to vector<8x1xf32>
    %138 = vector.broadcast %137 : vector<8x1xf32> to vector<8x128xf32>
    %139 = vector.extract_strided_slice %3 {offsets = [0, 7], sizes = [8, 1], strides = [1, 1]} : vector<8x12xf32> to vector<8x1xf32>
    %140 = vector.shape_cast %139 : vector<8x1xf32> to vector<8x1xf32>
    %141 = vector.broadcast %140 : vector<8x1xf32> to vector<8x128xf32>
    %142 = vector.extract_strided_slice %3 {offsets = [0, 11], sizes = [8, 1], strides = [1, 1]} : vector<8x12xf32> to vector<8x1xf32>
    %143 = vector.shape_cast %142 : vector<8x1xf32> to vector<8x1xf32>
    %144 = vector.broadcast %143 : vector<8x1xf32> to vector<8x128xf32>
    %145 = vector.extract_strided_slice %23 {offsets = [3, 0], sizes = [1, 128], strides = [1, 1]} : vector<4x128xf32> to vector<1x128xf32>
    %146 = vector.shape_cast %145 : vector<1x128xf32> to vector<1x128xf32>
    %147 = vector.broadcast %146 : vector<1x128xf32> to vector<8x128xf32>
    %148 = vector.extract_strided_slice %24 {offsets = [3, 0], sizes = [1, 128], strides = [1, 1]} : vector<4x128xf32> to vector<1x128xf32>
    %149 = vector.shape_cast %148 : vector<1x128xf32> to vector<1x128xf32>
    %150 = vector.broadcast %149 : vector<1x128xf32> to vector<8x128xf32>
    %151 = vector.extract_strided_slice %33 {offsets = [3, 0], sizes = [1, 128], strides = [1, 1]} : vector<4x128xf32> to vector<1x128xf32>
    %152 = vector.broadcast %151 : vector<1x128xf32> to vector<8x128xf32>
    %153 = arith.mulf %138, %152 : vector<8x128xf32>
    %154 = arith.addf %127, %153 : vector<8x128xf32>
    %155 = arith.mulf %141, %147 : vector<8x128xf32>
    %156 = arith.addf %154, %155 : vector<8x128xf32>
    %157 = arith.mulf %144, %150 : vector<8x128xf32>
    %158 = arith.addf %156, %157 : vector<8x128xf32>
    %159 = arith.mulf %138, %147 : vector<8x128xf32>
    %160 = arith.addf %135, %159 : vector<8x128xf32>
    %161 = arith.mulf %141, %150 : vector<8x128xf32>
    %162 = arith.addf %160, %161 : vector<8x128xf32>
    %163 = vector.extract_strided_slice %40 {offsets = [3, 0], sizes = [1, 128], strides = [1, 1]} : vector<4x128xf32> to vector<1x128xf32>
    %164 = vector.broadcast %163 : vector<1x128xf32> to vector<8x128xf32>
    %165 = arith.mulf %144, %164 : vector<8x128xf32>
    %166 = arith.addf %162, %165 : vector<8x128xf32>
    %c0_14 = arith.constant 0 : index
    %c0_15 = arith.constant 0 : index
    %167 = vector.load %arg3[%c0_14, %c0_15] : memref<8x128xf32, #tpu.memory_space<vmem>>, vector<8x128xf32>
    %168 = arith.addf %158, %166 : vector<8x128xf32>
    %169 = arith.addf %167, %168 : vector<8x128xf32>
    %c0_16 = arith.constant 0 : index
    %c0_17 = arith.constant 0 : index
    %170 = vector.load %arg3[%c0_16, %c0_17] : memref<8x128xf32, #tpu.memory_space<vmem>>, vector<8x128xf32>
    tpu.vector_store %arg3[%c0_16, %c0_17], %169 {strides = array<i32>} : memref<8x128xf32, #tpu.memory_space<vmem>>, vector<8x128xf32>,
    %c0_18 = arith.constant 0 : index
    %c0_19 = arith.constant 0 : index
    %171 = vector.load %arg4[%c0_18, %c0_19] : memref<8x128xf32, #tpu.memory_space<vmem>>, vector<8x128xf32>
    %172 = arith.mulf %158, %158 : vector<8x128xf32>
    %173 = arith.mulf %166, %166 : vector<8x128xf32>
    %174 = arith.addf %172, %173 : vector<8x128xf32>
    %175 = arith.addf %171, %174 : vector<8x128xf32>
    %c0_20 = arith.constant 0 : index
    %c0_21 = arith.constant 0 : index
    %176 = vector.load %arg4[%c0_20, %c0_21] : memref<8x128xf32, #tpu.memory_space<vmem>>, vector<8x128xf32>
    tpu.vector_store %arg4[%c0_20, %c0_21], %175 {strides = array<i32>} : memref<8x128xf32, #tpu.memory_space<vmem>>, vector<8x128xf32>,
    %c1 = arith.constant 1 : index
    %c0_22 = arith.constant 0 : index
    %c0_23 = arith.constant 0 : index
    %177 = vector.load %arg1[%c1, %c0_22, %c0_23] : memref<2x8x128xf32, #tpu.memory_space<vmem>>, vector<1x8x128xf32>
    %178 = vector.shape_cast %177 : vector<1x8x128xf32> to vector<8x128xf32>
    %179 = tpu.iota {dimensions = array<i32: 1>} : vector<1x128xi32>
    %c8_i32_24 = arith.constant 8 : i32
    %c0_i32_25 = arith.constant 0 : i32
    %180 = arith.cmpi eq, %c8_i32_24, %c0_i32_25 : i32
    %c1_i32_26 = arith.constant 1 : i32
    %181 = arith.select %180, %c1_i32_26, %c8_i32_24 : i32
    %182 = vector.broadcast %181 : i32 to vector<1x128xi32>
    %183 = arith.remsi %179, %182 : vector<1x128xi32>
    %c0_i32_27 = arith.constant 0 : i32
    %184 = vector.broadcast %c0_i32_27 : i32 to vector<1x128xi32>
    %185 = arith.cmpi ne, %183, %184 : vector<1x128xi32>
    %c0_i32_28 = arith.constant 0 : i32
    %186 = vector.broadcast %c0_i32_28 : i32 to vector<1x128xi32>
    %187 = arith.cmpi slt, %183, %186 : vector<1x128xi32>
    %c0_i32_29 = arith.constant 0 : i32
    %188 = arith.cmpi slt, %181, %c0_i32_29 : i32
    %189 = vector.broadcast %188 : i1 to vector<1x128xi1>
    %190 = vector.broadcast %189 : vector<1x128xi1> to vector<1x128xi1>
    %191 = arith.xori %187, %190 : vector<1x128xi1>
    %192 = arith.andi %191, %185 : vector<1x128xi1>
    %193 = vector.broadcast %181 : i32 to vector<1x128xi32>
    %194 = arith.addi %183, %193 : vector<1x128xi32>
    %195 = arith.select %192, %194, %183 : vector<1x128xi1>, vector<1x128xi32>
    %196 = vector.extract_strided_slice %178 {offsets = [0, 0], sizes = [4, 128], strides = [1, 1]} : vector<8x128xf32> to vector<4x128xf32>
    %197 = vector.extract_strided_slice %178 {offsets = [4, 0], sizes = [4, 128], strides = [1, 1]} : vector<8x128xf32> to vector<4x128xf32>
    %c1_i32_30 = arith.constant 1 : i32
    %198 = tpu.dynamic_rotate %178 by %c1_i32_30 dim 1 : vector<8x128xf32>, i32 -> vector<8x128xf32>
    %c127_i32_31 = arith.constant 127 : i32
    %199 = tpu.dynamic_rotate %178 by %c127_i32_31 dim 1 : vector<8x128xf32>, i32 -> vector<8x128xf32>
    %c0_i32_32 = arith.constant 0 : i32
    %200 = vector.broadcast %c0_i32_32 : i32 to vector<1x128xi32>
    %201 = arith.cmpi ne, %195, %200 : vector<1x128xi32>
    %202 = vector.extract_strided_slice %198 {offsets = [4, 0], sizes = [4, 128], strides = [1, 1]} : vector<8x128xf32> to vector<4x128xf32>
    %cst_33 = arith.constant 0.000000e+00 : f32
    %203 = vector.shape_cast %201 : vector<1x128xi1> to vector<1x128xi1>
    %204 = vector.broadcast %203 : vector<1x128xi1> to vector<4x128xi1>
    %205 = vector.broadcast %cst_33 : f32 to vector<4x128xf32>
    %206 = arith.select %204, %202, %205 : vector<4x128xi1>, vector<4x128xf32>
    %c7_i32_34 = arith.constant 7 : i32
    %207 = vector.broadcast %c7_i32_34 : i32 to vector<1x128xi32>
    %208 = arith.cmpi ne, %195, %207 : vector<1x128xi32>
    %209 = vector.extract_strided_slice %199 {offsets = [0, 0], sizes = [4, 128], strides = [1, 1]} : vector<8x128xf32> to vector<4x128xf32>
    %cst_35 = arith.constant 0.000000e+00 : f32
    %210 = vector.shape_cast %208 : vector<1x128xi1> to vector<1x128xi1>
    %211 = vector.broadcast %210 : vector<1x128xi1> to vector<4x128xi1>
    %212 = vector.broadcast %cst_35 : f32 to vector<4x128xf32>
    %213 = arith.select %211, %209, %212 : vector<4x128xi1>, vector<4x128xf32>
    %cst_36 = arith.constant 0.000000e+00 : f32
    %214 = vector.broadcast %cst_36 : f32 to vector<8x128xf32>
    %cst_37 = arith.constant 0.000000e+00 : f32
    %215 = vector.broadcast %cst_37 : f32 to vector<8x128xf32>
    %216 = vector.extract_strided_slice %3 {offsets = [0, 0], sizes = [8, 1], strides = [1, 1]} : vector<8x12xf32> to vector<8x1xf32>
    %217 = vector.shape_cast %216 : vector<8x1xf32> to vector<8x1xf32>
    %218 = vector.broadcast %217 : vector<8x1xf32> to vector<8x128xf32>
    %219 = vector.extract_strided_slice %3 {offsets = [0, 4], sizes = [8, 1], strides = [1, 1]} : vector<8x12xf32> to vector<8x1xf32>
    %220 = vector.shape_cast %219 : vector<8x1xf32> to vector<8x1xf32>
    %221 = vector.broadcast %220 : vector<8x1xf32> to vector<8x128xf32>
    %222 = vector.extract_strided_slice %3 {offsets = [0, 8], sizes = [8, 1], strides = [1, 1]} : vector<8x12xf32> to vector<8x1xf32>
    %223 = vector.shape_cast %222 : vector<8x1xf32> to vector<8x1xf32>
    %224 = vector.broadcast %223 : vector<8x1xf32> to vector<8x128xf32>
    %225 = vector.extract_strided_slice %196 {offsets = [0, 0], sizes = [1, 128], strides = [1, 1]} : vector<4x128xf32> to vector<1x128xf32>
    %226 = vector.shape_cast %225 : vector<1x128xf32> to vector<1x128xf32>
    %227 = vector.broadcast %226 : vector<1x128xf32> to vector<8x128xf32>
    %228 = vector.extract_strided_slice %197 {offsets = [0, 0], sizes = [1, 128], strides = [1, 1]} : vector<4x128xf32> to vector<1x128xf32>
    %229 = vector.shape_cast %228 : vector<1x128xf32> to vector<1x128xf32>
    %230 = vector.broadcast %229 : vector<1x128xf32> to vector<8x128xf32>
    %231 = vector.extract_strided_slice %206 {offsets = [0, 0], sizes = [1, 128], strides = [1, 1]} : vector<4x128xf32> to vector<1x128xf32>
    %232 = vector.broadcast %231 : vector<1x128xf32> to vector<8x128xf32>
    %233 = arith.mulf %218, %232 : vector<8x128xf32>
    %234 = arith.addf %214, %233 : vector<8x128xf32>
    %235 = arith.mulf %221, %227 : vector<8x128xf32>
    %236 = arith.addf %234, %235 : vector<8x128xf32>
    %237 = arith.mulf %224, %230 : vector<8x128xf32>
    %238 = arith.addf %236, %237 : vector<8x128xf32>
    %239 = arith.mulf %218, %227 : vector<8x128xf32>
    %240 = arith.addf %215, %239 : vector<8x128xf32>
    %241 = arith.mulf %221, %230 : vector<8x128xf32>
    %242 = arith.addf %240, %241 : vector<8x128xf32>
    %243 = vector.extract_strided_slice %213 {offsets = [0, 0], sizes = [1, 128], strides = [1, 1]} : vector<4x128xf32> to vector<1x128xf32>
    %244 = vector.broadcast %243 : vector<1x128xf32> to vector<8x128xf32>
    %245 = arith.mulf %224, %244 : vector<8x128xf32>
    %246 = arith.addf %242, %245 : vector<8x128xf32>
    %247 = vector.extract_strided_slice %3 {offsets = [0, 1], sizes = [8, 1], strides = [1, 1]} : vector<8x12xf32> to vector<8x1xf32>
    %248 = vector.shape_cast %247 : vector<8x1xf32> to vector<8x1xf32>
    %249 = vector.broadcast %248 : vector<8x1xf32> to vector<8x128xf32>
    %250 = vector.extract_strided_slice %3 {offsets = [0, 5], sizes = [8, 1], strides = [1, 1]} : vector<8x12xf32> to vector<8x1xf32>
    %251 = vector.shape_cast %250 : vector<8x1xf32> to vector<8x1xf32>
    %252 = vector.broadcast %251 : vector<8x1xf32> to vector<8x128xf32>
    %253 = vector.extract_strided_slice %3 {offsets = [0, 9], sizes = [8, 1], strides = [1, 1]} : vector<8x12xf32> to vector<8x1xf32>
    %254 = vector.shape_cast %253 : vector<8x1xf32> to vector<8x1xf32>
    %255 = vector.broadcast %254 : vector<8x1xf32> to vector<8x128xf32>
    %256 = vector.extract_strided_slice %196 {offsets = [1, 0], sizes = [1, 128], strides = [1, 1]} : vector<4x128xf32> to vector<1x128xf32>
    %257 = vector.shape_cast %256 : vector<1x128xf32> to vector<1x128xf32>
    %258 = vector.broadcast %257 : vector<1x128xf32> to vector<8x128xf32>
    %259 = vector.extract_strided_slice %197 {offsets = [1, 0], sizes = [1, 128], strides = [1, 1]} : vector<4x128xf32> to vector<1x128xf32>
    %260 = vector.shape_cast %259 : vector<1x128xf32> to vector<1x128xf32>
    %261 = vector.broadcast %260 : vector<1x128xf32> to vector<8x128xf32>
    %262 = vector.extract_strided_slice %206 {offsets = [1, 0], sizes = [1, 128], strides = [1, 1]} : vector<4x128xf32> to vector<1x128xf32>
    %263 = vector.broadcast %262 : vector<1x128xf32> to vector<8x128xf32>
    %264 = arith.mulf %249, %263 : vector<8x128xf32>
    %265 = arith.addf %238, %264 : vector<8x128xf32>
    %266 = arith.mulf %252, %258 : vector<8x128xf32>
    %267 = arith.addf %265, %266 : vector<8x128xf32>
    %268 = arith.mulf %255, %261 : vector<8x128xf32>
    %269 = arith.addf %267, %268 : vector<8x128xf32>
    %270 = arith.mulf %249, %258 : vector<8x128xf32>
    %271 = arith.addf %246, %270 : vector<8x128xf32>
    %272 = arith.mulf %252, %261 : vector<8x128xf32>
    %273 = arith.addf %271, %272 : vector<8x128xf32>
    %274 = vector.extract_strided_slice %213 {offsets = [1, 0], sizes = [1, 128], strides = [1, 1]} : vector<4x128xf32> to vector<1x128xf32>
    %275 = vector.broadcast %274 : vector<1x128xf32> to vector<8x128xf32>
    %276 = arith.mulf %255, %275 : vector<8x128xf32>
    %277 = arith.addf %273, %276 : vector<8x128xf32>
    %278 = vector.extract_strided_slice %3 {offsets = [0, 2], sizes = [8, 1], strides = [1, 1]} : vector<8x12xf32> to vector<8x1xf32>
    %279 = vector.shape_cast %278 : vector<8x1xf32> to vector<8x1xf32>
    %280 = vector.broadcast %279 : vector<8x1xf32> to vector<8x128xf32>
    %281 = vector.extract_strided_slice %3 {offsets = [0, 6], sizes = [8, 1], strides = [1, 1]} : vector<8x12xf32> to vector<8x1xf32>
    %282 = vector.shape_cast %281 : vector<8x1xf32> to vector<8x1xf32>
    %283 = vector.broadcast %282 : vector<8x1xf32> to vector<8x128xf32>
    %284 = vector.extract_strided_slice %3 {offsets = [0, 10], sizes = [8, 1], strides = [1, 1]} : vector<8x12xf32> to vector<8x1xf32>
    %285 = vector.shape_cast %284 : vector<8x1xf32> to vector<8x1xf32>
    %286 = vector.broadcast %285 : vector<8x1xf32> to vector<8x128xf32>
    %287 = vector.extract_strided_slice %196 {offsets = [2, 0], sizes = [1, 128], strides = [1, 1]} : vector<4x128xf32> to vector<1x128xf32>
    %288 = vector.shape_cast %287 : vector<1x128xf32> to vector<1x128xf32>
    %289 = vector.broadcast %288 : vector<1x128xf32> to vector<8x128xf32>
    %290 = vector.extract_strided_slice %197 {offsets = [2, 0], sizes = [1, 128], strides = [1, 1]} : vector<4x128xf32> to vector<1x128xf32>
    %291 = vector.shape_cast %290 : vector<1x128xf32> to vector<1x128xf32>
    %292 = vector.broadcast %291 : vector<1x128xf32> to vector<8x128xf32>
    %293 = vector.extract_strided_slice %206 {offsets = [2, 0], sizes = [1, 128], strides = [1, 1]} : vector<4x128xf32> to vector<1x128xf32>
    %294 = vector.broadcast %293 : vector<1x128xf32> to vector<8x128xf32>
    %295 = arith.mulf %280, %294 : vector<8x128xf32>
    %296 = arith.addf %269, %295 : vector<8x128xf32>
    %297 = arith.mulf %283, %289 : vector<8x128xf32>
    %298 = arith.addf %296, %297 : vector<8x128xf32>
    %299 = arith.mulf %286, %292 : vector<8x128xf32>
    %300 = arith.addf %298, %299 : vector<8x128xf32>
    %301 = arith.mulf %280, %289 : vector<8x128xf32>
    %302 = arith.addf %277, %301 : vector<8x128xf32>
    %303 = arith.mulf %283, %292 : vector<8x128xf32>
    %304 = arith.addf %302, %303 : vector<8x128xf32>
    %305 = vector.extract_strided_slice %213 {offsets = [2, 0], sizes = [1, 128], strides = [1, 1]} : vector<4x128xf32> to vector<1x128xf32>
    %306 = vector.broadcast %305 : vector<1x128xf32> to vector<8x128xf32>
    %307 = arith.mulf %286, %306 : vector<8x128xf32>
    %308 = arith.addf %304, %307 : vector<8x128xf32>
    %309 = vector.extract_strided_slice %3 {offsets = [0, 3], sizes = [8, 1], strides = [1, 1]} : vector<8x12xf32> to vector<8x1xf32>
    %310 = vector.shape_cast %309 : vector<8x1xf32> to vector<8x1xf32>
    %311 = vector.broadcast %310 : vector<8x1xf32> to vector<8x128xf32>
    %312 = vector.extract_strided_slice %3 {offsets = [0, 7], sizes = [8, 1], strides = [1, 1]} : vector<8x12xf32> to vector<8x1xf32>
    %313 = vector.shape_cast %312 : vector<8x1xf32> to vector<8x1xf32>
    %314 = vector.broadcast %313 : vector<8x1xf32> to vector<8x128xf32>
    %315 = vector.extract_strided_slice %3 {offsets = [0, 11], sizes = [8, 1], strides = [1, 1]} : vector<8x12xf32> to vector<8x1xf32>
    %316 = vector.shape_cast %315 : vector<8x1xf32> to vector<8x1xf32>
    %317 = vector.broadcast %316 : vector<8x1xf32> to vector<8x128xf32>
    %318 = vector.extract_strided_slice %196 {offsets = [3, 0], sizes = [1, 128], strides = [1, 1]} : vector<4x128xf32> to vector<1x128xf32>
    %319 = vector.shape_cast %318 : vector<1x128xf32> to vector<1x128xf32>
    %320 = vector.broadcast %319 : vector<1x128xf32> to vector<8x128xf32>
    %321 = vector.extract_strided_slice %197 {offsets = [3, 0], sizes = [1, 128], strides = [1, 1]} : vector<4x128xf32> to vector<1x128xf32>
    %322 = vector.shape_cast %321 : vector<1x128xf32> to vector<1x128xf32>
    %323 = vector.broadcast %322 : vector<1x128xf32> to vector<8x128xf32>
    %324 = vector.extract_strided_slice %206 {offsets = [3, 0], sizes = [1, 128], strides = [1, 1]} : vector<4x128xf32> to vector<1x128xf32>
    %325 = vector.broadcast %324 : vector<1x128xf32> to vector<8x128xf32>
    %326 = arith.mulf %311, %325 : vector<8x128xf32>
    %327 = arith.addf %300, %326 : vector<8x128xf32>
    %328 = arith.mulf %314, %320 : vector<8x128xf32>
    %329 = arith.addf %327, %328 : vector<8x128xf32>
    %330 = arith.mulf %317, %323 : vector<8x128xf32>
    %331 = arith.addf %329, %330 : vector<8x128xf32>
    %332 = arith.mulf %311, %320 : vector<8x128xf32>
    %333 = arith.addf %308, %332 : vector<8x128xf32>
    %334 = arith.mulf %314, %323 : vector<8x128xf32>
    %335 = arith.addf %333, %334 : vector<8x128xf32>
    %336 = vector.extract_strided_slice %213 {offsets = [3, 0], sizes = [1, 128], strides = [1, 1]} : vector<4x128xf32> to vector<1x128xf32>
    %337 = vector.broadcast %336 : vector<1x128xf32> to vector<8x128xf32>
    %338 = arith.mulf %317, %337 : vector<8x128xf32>
    %339 = arith.addf %335, %338 : vector<8x128xf32>
    %c0_38 = arith.constant 0 : index
    %c0_39 = arith.constant 0 : index
    %340 = vector.load %arg3[%c0_38, %c0_39] : memref<8x128xf32, #tpu.memory_space<vmem>>, vector<8x128xf32>
    %341 = arith.addf %331, %339 : vector<8x128xf32>
    %342 = arith.addf %340, %341 : vector<8x128xf32>
    %c0_40 = arith.constant 0 : index
    %c0_41 = arith.constant 0 : index
    %343 = vector.load %arg3[%c0_40, %c0_41] : memref<8x128xf32, #tpu.memory_space<vmem>>, vector<8x128xf32>
    tpu.vector_store %arg3[%c0_40, %c0_41], %342 {strides = array<i32>} : memref<8x128xf32, #tpu.memory_space<vmem>>, vector<8x128xf32>,
    %c0_42 = arith.constant 0 : index
    %c0_43 = arith.constant 0 : index
    %344 = vector.load %arg4[%c0_42, %c0_43] : memref<8x128xf32, #tpu.memory_space<vmem>>, vector<8x128xf32>
    %345 = arith.mulf %331, %331 : vector<8x128xf32>
    %346 = arith.mulf %339, %339 : vector<8x128xf32>
    %347 = arith.addf %345, %346 : vector<8x128xf32>
    %348 = arith.addf %344, %347 : vector<8x128xf32>
    %c0_44 = arith.constant 0 : index
    %c0_45 = arith.constant 0 : index
    %349 = vector.load %arg4[%c0_44, %c0_45] : memref<8x128xf32, #tpu.memory_space<vmem>>, vector<8x128xf32>
    tpu.vector_store %arg4[%c0_44, %c0_45], %348 {strides = array<i32>} : memref<8x128xf32, #tpu.memory_space<vmem>>, vector<8x128xf32>,
    return
  }
  func.func @transform_0(%arg0: i32) -> (i32, i32, i32) {
    %c0_i32 = arith.constant 0 : i32
    %c0_i32_0 = arith.constant 0 : i32
    %c0_i32_1 = arith.constant 0 : i32
    return %arg0, %c0_i32, %c0_i32_0 : i32, i32, i32
  }
  func.func @transform_1(%arg0: i32) -> (i32, i32) {
    %c0_i32 = arith.constant 0 : i32
    %c0_i32_0 = arith.constant 0 : i32
    %c0_i32_1 = arith.constant 0 : i32
    return %c0_i32, %c0_i32_0 : i32, i32
  }
  func.func @transform_2(%arg0: i32) -> (i32, i32) {
    %c0_i32 = arith.constant 0 : i32
    %c0_i32_0 = arith.constant 0 : i32
    %c0_i32_1 = arith.constant 0 : i32
    return %c0_i32, %c0_i32_0 : i32, i32
  }
  func.func @transform_3(%arg0: i32) -> (i32, i32) {
    %c0_i32 = arith.constant 0 : i32
    %c0_i32_0 = arith.constant 0 : i32
    %c0_i32_1 = arith.constant 0 : i32
    return %c0_i32, %c0_i32_0 : i32, i32
  }
}

</mosaic_0001>

<bundles_post_ra>
// kernel: tpu_custom_call.1
= control target key start
LH: loop header
LB: loop body
LE: loop exit
PB: predicated region body
PF: predicated region fallthrough
CT: control target
= control target key end

     0   :  { %9 = vsyncpa [#allocation3], 0  ;;  %s596_s0 = inlined_call_operand.hbm [shape: f32[2,8,128], index: 0, kind: input, shape index: {}]   ;;  %s597_s1 = inlined_call_operand.hbm [shape: f32[8,12], index: 1, kind: input, shape index: {}]   ;;  %s598_s2 = inlined_call_operand.hbm [shape: f32[8,128], index: 2, kind: output, shape index: {0}]   ;;  %s599_s3 = inlined_call_operand.hbm [shape: f32[8,128], index: 3, kind: output, shape index: {1}]  }
   0x1   :  { %10 = vsyncpa [#allocation6], 0 }
   0x2   :  { %11 = vsyncpa [#allocation4], 0 }
   0x3   :  { %12 = vsyncpa [#allocation9], 0  ;;  %s17_s14 = sshll.u32 %s596_s0, 4  ;;  %s456_s15 = smov [#allocation2]   ;;  %s18_s14 = int_to_ptr.hbm [resolvable:$true] %s17_s14 }
   0x4   :  { %s19_s16 = sshll.u32 %s456_s15, 4  ;;  %s31_s19 = sshll.u32 %s597_s1, 4  ;;  %s20_s16 = int_to_ptr.vmem [resolvable:$true] %s19_s16  ;;  %s32_s19 = int_to_ptr.hbm [resolvable:$true] %s31_s19 }
   0x5   :  { %s457_s20 = smov 128   ;;  %s458_s21 = smov 8  }
   0x6   :  { %25 = dma.hbm_to_vmem [thread:$0]  %s18_s14, 256, %s20_s16, [#allocation3], %s457_s20, %s457_s20, %s458_s21  }
   0x7   :  { %s459_s22 = smov [#allocation5]  }
   0x8   :  { %s33_s23 = sshll.u32 %s459_s22, 4  ;;  %s34_s23 = int_to_ptr.vmem [resolvable:$true] %s33_s23 }
   0x9   :  { %36 = dma.hbm_to_vmem [thread:$0]  %s32_s19, 128, %s34_s23, [#allocation6]  }
   0xa   :  { %448 = dma.done.wait [#allocation3], 256  }
   0xb   :  { %449 = vsyncadd [#allocation3], 4294967040 }
   0xc   :  { %450 = dma.done.wait [#allocation6], 128  }
   0xd   :  { %451 = vsyncadd [#allocation6], 4294967168  ;;  %v460_v0 = vmov 0   ;;  %v461_v1 = vmov 8   ;;  %v462_v2 = vmov 5   ;;  %v502_v3 = vld [vmem:[#allocation2] sm:$0xff]  ;;  %v53_v16 = vlaneseq }
   0xe   :  { %339 = vset.pattern.permute.xlu1 %v460_v0  ;;  %341 = vset.pattern.permute.xlu2 %v461_v1  ;;  %v51_v4 = vld [vmem:[#allocation5] sm:$0xff]  ;;  %s463_s0 = smov 1   ;;  %s464_s1 = smov 127   ;;  %v465_v5 = vmov 4   ;;  %v466_v6 = vmov 1   ;;  %v506_v7 = vld [vmem:[#allocation2 + $0x8] sm:$0xff] }
   0xf   :  { %343 = vset.pattern.permute.xlu0 %v462_v2  ;;  %81 = vperm.xlu1 %339, %v51_v4   ;;  %v467_v8 = vmov 9   ;;  %v468_v9 = vmov 10   ;;  %v469_v10 = vmov 6   ;;  %v470_v11 = vmov 2   ;;  %s474_s24 = smov [#allocation7]   ;;  %s291_s28 = sshll.u32 %s598_s2, 4  ;;  %s292_s28 = int_to_ptr.hbm [resolvable:$true] %s291_s28 }
  0x10   :  { %67 = vrot.lane.b32.xlu0 %v502_v3, %s463_s0  ;;  %89 = vperm.xlu2 %341, %v51_v4   ;;  %v471_v12 = vmov 11   ;;  %v472_v13 = vmov 3   ;;  %v473_v14 = vmov 7   ;;  %v54_v17 = vand.u32 127, %v53_v16  ;;  %s289_s25 = sshll.u32 %s474_s24, 4  ;;  %s475_s29 = smov [#allocation8]   ;;  %s290_s25 = int_to_ptr.vmem [resolvable:$true] %s289_s25 }
  0x11   :  { %v92_v26 = vperm.slane %v502_v3, 0  ;;  %v93_v28 = vperm.slane %v502_v3, 4  ;;  %v120_v42 = vperm.slane %v502_v3, 1  ;;  %v121_v45 = vperm.slane %v502_v3, 5  ;;  %s300_s30 = sshll.u32 %s475_s29, 4  ;;  %s302_s6 = sshll.u32 %s599_s3, 4  ;;  %s301_s30 = int_to_ptr.vmem [resolvable:$true] %s300_s30  ;;  %s303_s6 = int_to_ptr.hbm [resolvable:$true] %s302_s6 }
  0x12   :  { %v59_v18 = vand.u32 7, %v54_v17  ;;  %v210_v46 = vperm.slane %v506_v7, 0  ;;  %v211_v50 = vperm.slane %v506_v7, 4  ;;  %v226_v53 = vperm.slane %v506_v7, 1 }
  0x13   :  { %v148_v17 = vperm.slane %v502_v3, 2  ;;  %v149_v22 = vperm.slane %v502_v3, 6 }
  0x14   :  { %vm514_vm0 = vcmp.ne.s32.totalorder %v59_v18, 0  ;;  %vm522_vm1 = vcmp.ne.s32.totalorder %v59_v18, 7 }
  0x17   :  { %340 = vset.pattern.permute.xlu1 %v465_v5 }
  0x18   :  { %69 = vrot.lane.b32.xlu0 %v502_v3, %s464_s1  ;;  %342 = vset.pattern.permute.xlu2 %v466_v6 }
  0x19   :  { %85 = vperm.xlu1 %340, %v51_v4   ;;  %109 = vperm.xlu2 %342, %v51_v4  }
  0x20   :  { %113 = vperm.xlu0 %343, %v51_v4  }
  0x21   :  { %204 = vrot.lane.b32.xlu1 %v506_v7, %s463_s0  ;;  %344 = vset.pattern.permute.xlu2 %v467_v8 }
  0x22   :  { %347 = vset.pattern.permute.xlu1 %v468_v9  ;;  %117 = vperm.xlu2 %344, %v51_v4  }
  0x28   :  { %346 = vset.pattern.permute.xlu0 %v469_v10 }
  0x29   :  { %141 = vperm.xlu0 %346, %v51_v4   ;;  %206 = vrot.lane.b32.xlu1 %v506_v7, %s464_s1 }
  0x2a   :  { %345 = vset.pattern.permute.xlu2 %v470_v11 }
  0x2b   :  { %137 = vperm.xlu2 %345, %v51_v4  }
  0x31   :  { %145 = vperm.xlu1 %347, %v51_v4   ;;  %351 = vset.pattern.permute.xlu0 %v471_v12 }
  0x33   :  { %348 = vset.pattern.permute.xlu2 %v472_v13 }
  0x34   :  { %165 = vperm.xlu2 %348, %v51_v4  }
  0x39   :  { %349 = vset.pattern.permute.xlu1 %v473_v14 }
  0x3a   :  { %169 = vperm.xlu1 %349, %v51_v4  }
  0x3c   :  { %350 = vset.pattern.permute.xlu2 %v471_v12 }
  0x3d   :  { %173 = vperm.xlu2 %350, %v51_v4   ;;  %v227_v4 = vperm.slane %v506_v7, 5 }
  0x6a   :  { %v510_v15 = vpop.permute.xlu2 %89 }
  0x6b   :  { %v99_v40 = vmul.f32 %v93_v28, %v510_v15  ;;  %v217_v0 = vmul.f32 %v211_v50, %v510_v15 }
  0x73   :  { %v110_v19 = vpop.permute.xlu2 %109 }
  0x74   :  { %v129_v54 = vmul.f32 %v120_v42, %v110_v19  ;;  %v235_v2 = vmul.f32 %v226_v53, %v110_v19 }
  0x7c   :  { %v533_v31 = vpop.permute.xlu2 %117 }
  0x7d   :  { %v127_v5 = vmul.f32 %v121_v45, %v533_v31 }
  0x81   :  { %v512_v21 = vpop.permute.xlu1 %81 }
  0x82   :  { %v68_v20 = vpop.permute.xlu0 %67  ;;  %v101_v36 = vmul.f32 %v92_v26, %v512_v21 }
  0x83   :  { %v520_v23 = vsel %vm514_vm0, %v68_v20, 0.0 }
  0x84   :  { %v94_v25 = vperm.slane %v520_v23, 4  ;;  %v122_v41 = vperm.slane %v520_v23, 5  ;;  %v150_v6 = vperm.slane %v520_v23, 6 }
  0x85   :  { %v551_v55 = vpop.permute.xlu2 %137 }
  0x86   :  { %v95_v33 = vmul.f32 %v94_v25, %v512_v21  ;;  %v123_v51 = vmul.f32 %v122_v41, %v110_v19 }
  0x8a   :  { %v70_v27 = vpop.permute.xlu0 %69 }
  0x8b   :  { %v531_v29 = vsel %vm522_vm1, %v70_v27, 0.0  ;;  %v86_v30 = vpop.permute.xlu1 %85  ;;  %v242_v27 = vperm.slane %v506_v7, 2 }
  0x8c   :  { %v105_v32 = vperm.slane %v531_v29, 0  ;;  %v97_v34 = vmul.f32 %v92_v26, %v86_v30  ;;  %v103_v35 = vmul.f32 %v93_v28, %v86_v30  ;;  %v215_v56 = vmul.f32 %v210_v46, %v86_v30 }
  0x8d   :  { %v133_v61 = vperm.slane %v531_v29, 1  ;;  %v221_v14 = vmul.f32 %v211_v50, %v86_v30  ;;  %v233_v26 = vmul.f32 %v227_v4, %v533_v31  ;;  %v151_v30 = vmul.f32 %v150_v6, %v551_v55 }
  0x8e   :  { %v98_v37 = vadd.f32 %v97_v34, %v95_v33  ;;  %v106_v38 = vmul.f32 %v105_v32, %v510_v15  ;;  %v104_v39 = vadd.f32 %v103_v35, %v101_v36  ;;  %v243_v33 = vperm.slane %v506_v7, 6 }
  0x8f   :  { %v134_v13 = vmul.f32 %v133_v61, %v533_v31 }
  0x90   :  { %v100_v43 = vadd.f32 %v99_v40, %v98_v37  ;;  %v107_v47 = vadd.f32 %v106_v38, %v104_v39  ;;  %v166_v37 = vpop.permute.xlu2 %165  ;;  %v157_v38 = vmul.f32 %v148_v17, %v551_v55 }
  0x92   :  { %v114_v48 = vpop.permute.xlu0 %113  ;;  %v124_v57 = vadd.f32 %v123_v51, %v100_v43  ;;  %v130_v62 = vadd.f32 %v129_v54, %v107_v47 }
  0x93   :  { %v205_v44 = vpop.permute.xlu1 %204  ;;  %v125_v58 = vmul.f32 %v120_v42, %v114_v48  ;;  %v131_v63 = vmul.f32 %v121_v45, %v114_v48  ;;  %v231_v9 = vmul.f32 %v226_v53, %v114_v48  ;;  %v237_v47 = vmul.f32 %v227_v4, %v114_v48 }
  0x94   :  { %v546_v49 = vsel %vm514_vm0, %v205_v44, 0.0  ;;  %v176_v53 = vperm.slane %v502_v3, 3 }
  0x95   :  { %v212_v52 = vperm.slane %v546_v49, 4  ;;  %v228_v60 = vperm.slane %v546_v49, 5  ;;  %v126_v8 = vadd.f32 %v125_v58, %v124_v57  ;;  %v132_v16 = vadd.f32 %v131_v63, %v130_v62 }
  0x96   :  { %v244_v20 = vperm.slane %v546_v49, 6  ;;  %v178_v58 = vperm.slane %v520_v23, 7  ;;  %v260_v48 = vperm.slane %v546_v49, 7  ;;  %v258_v23 = vperm.slane %v506_v7, 3 }
  0x97   :  { %v213_v59 = vmul.f32 %v212_v52, %v512_v21  ;;  %v229_v11 = vmul.f32 %v228_v60, %v110_v19  ;;  %v219_v19 = vmul.f32 %v210_v46, %v512_v21  ;;  %v128_v35 = vadd.f32 %v127_v5, %v126_v8 }
  0x98   :  { %v135_v24 = vadd.f32 %v134_v13, %v132_v16  ;;  %v161_v21 = vperm.slane %v531_v29, 2  ;;  %v245_v40 = vmul.f32 %v244_v20, %v551_v55  ;;  %v185_v8 = vmul.f32 %v176_v53, %v166_v37 }
  0x99   :  { %v216_v1 = vadd.f32 %v215_v56, %v213_v59  ;;  %v222_v36 = vadd.f32 %v221_v14, %v219_v19  ;;  %v152_v50 = vadd.f32 %v151_v30, %v128_v35  ;;  %v261_v49 = vmul.f32 %v260_v48, %v166_v37 }
  0x9a   :  { %v158_v54 = vadd.f32 %v157_v38, %v135_v24 }
  0x9b   :  { %v218_v10 = vadd.f32 %v217_v0, %v216_v1  ;;  %v207_v12 = vpop.permute.xlu1 %206  ;;  %v142_v34 = vpop.permute.xlu0 %141  ;;  %v251_v1 = vmul.f32 %v242_v27, %v551_v55  ;;  %v259_v55 = vperm.slane %v506_v7, 7 }
  0x9c   :  { %v566_v25 = vsel %vm522_vm1, %v207_v12, 0.0  ;;  %v247_v42 = vmul.f32 %v242_v27, %v142_v34  ;;  %v153_v43 = vmul.f32 %v148_v17, %v142_v34  ;;  %v159_v44 = vmul.f32 %v149_v22, %v142_v34 }
  0x9d   :  { %v230_v18 = vadd.f32 %v229_v11, %v218_v10  ;;  %v223_v28 = vperm.slane %v566_v25, 0  ;;  %v239_v46 = vperm.slane %v566_v25, 1  ;;  %v179_v10 = vmul.f32 %v178_v58, %v166_v37  ;;  %v174_v11 = vpop.permute.xlu2 %173 }
  0x9e   :  { %v154_v61 = vadd.f32 %v153_v43, %v152_v50  ;;  %v160_v62 = vadd.f32 %v159_v44, %v158_v54  ;;  %v253_v12 = vmul.f32 %v243_v33, %v142_v34  ;;  %v255_v14 = vperm.slane %v566_v25, 2 }
  0x9f   :  { %v232_v32 = vadd.f32 %v231_v9, %v230_v18  ;;  %v224_v39 = vmul.f32 %v223_v28, %v510_v15  ;;  %v240_v0 = vmul.f32 %v239_v46, %v533_v31  ;;  %v189_v31 = vperm.slane %v531_v29, 3 }
  0xa0   :  { %v265_v30 = vmul.f32 %v259_v55, %v174_v11  ;;  %v267_v34 = vmul.f32 %v258_v23, %v166_v37 }
  0xa1   :  { %v234_v41 = vadd.f32 %v233_v26, %v232_v32  ;;  %v225_v45 = vadd.f32 %v224_v39, %v222_v36  ;;  %v271_v32 = vperm.slane %v566_v25, 3  ;;  %v190_v35 = vmul.f32 %v189_v31, %v174_v11 }
  0xa3   :  { %v246_v51 = vadd.f32 %v245_v40, %v234_v41  ;;  %v146_v52 = vpop.permute.xlu1 %145  ;;  %v236_v56 = vadd.f32 %v235_v2, %v225_v45  ;;  %v177_v2 = vperm.slane %v502_v3, 7  ;;  %v272_v40 = vmul.f32 %v271_v32, %v174_v11 }
  0xa4   :  { %v155_v15 = vmul.f32 %v149_v22, %v146_v52  ;;  %v162_v57 = vmul.f32 %v161_v21, %v146_v52  ;;  %v249_v60 = vmul.f32 %v243_v33, %v146_v52  ;;  %v256_v18 = vmul.f32 %v255_v14, %v146_v52 }
  0xa5   :  { %v248_v59 = vadd.f32 %v247_v42, %v246_v51  ;;  %v238_v63 = vadd.f32 %v237_v47, %v236_v56  ;;  %v183_v16 = vmul.f32 %v177_v2, %v174_v11 }
  0xa6   :  { %v156_v5 = vadd.f32 %v155_v15, %v154_v61  ;;  %v163_v6 = vadd.f32 %v162_v57, %v160_v62 }
  0xa7   :  { %v241_v4 = vadd.f32 %v240_v0, %v238_v63  ;;  %v250_v9 = vadd.f32 %v249_v60, %v248_v59 }
  0xa8   :  { %v180_v20 = vadd.f32 %v179_v10, %v156_v5  ;;  %v186_v22 = vadd.f32 %v185_v8, %v163_v6 }
  0xa9   :  { %v252_v13 = vadd.f32 %v251_v1, %v241_v4  ;;  %v262_v26 = vadd.f32 %v261_v49, %v250_v9 }
  0xab   :  { %v254_v17 = vadd.f32 %v253_v12, %v252_v13 }
  0xac   :  { %v170_v3 = vpop.permute.xlu1 %169 }
  0xad   :  { %v181_v19 = vmul.f32 %v176_v53, %v170_v3  ;;  %v187_v27 = vmul.f32 %v177_v2, %v170_v3  ;;  %v263_v28 = vmul.f32 %v258_v23, %v170_v3  ;;  %v257_v33 = vadd.f32 %v256_v18, %v254_v17 }
  0xae   :  { %v269_v38 = vmul.f32 %v259_v55, %v170_v3 }
  0xaf   :  { %v182_v29 = vadd.f32 %v181_v19, %v180_v20  ;;  %v188_v36 = vadd.f32 %v187_v27, %v186_v22  ;;  %v264_v24 = vadd.f32 %v263_v28, %v262_v26  ;;  %v268_v7 = vadd.f32 %v267_v34, %v257_v33 }
  0xb1   :  { %v184_v39 = vadd.f32 %v183_v16, %v182_v29  ;;  %v191_v21 = vadd.f32 %v190_v35, %v188_v36  ;;  %v266_v41 = vadd.f32 %v265_v30, %v264_v24  ;;  %v270_v42 = vadd.f32 %v269_v38, %v268_v7 }
  0xb3   :  { %v193_v43 = vadd.f32 %v191_v21, %v184_v39  ;;  %v197_v44 = vmul.f32 %v184_v39, %v184_v39  ;;  %v198_v45 = vmul.f32 %v191_v21, %v191_v21  ;;  %v273_v46 = vadd.f32 %v272_v40, %v270_v42 }
  0xb4   :  { %v279_v37 = vmul.f32 %v266_v41, %v266_v41 }
  0xb5   :  { %v199_v47 = vadd.f32 %v198_v45, %v197_v44  ;;  %v275_v25 = vadd.f32 %v273_v46, %v266_v41  ;;  %v280_v50 = vmul.f32 %v273_v46, %v273_v46 }
  0xb7   :  { %v276_v51 = vadd.f32 %v275_v25, %v193_v43  ;;  %v281_v52 = vadd.f32 %v280_v50, %v279_v37 }
  0xb9   :  { %277 = vst [vmem:[#allocation7] sm:$0xff] %v276_v51  ;;  %v282_v53 = vadd.f32 %v281_v52, %v199_v47 }
  0xba   :  { %294 = dma.vmem_to_hbm [thread:$0]  %s290_s25, 128, %s292_s28, [#allocation4]  }
  0xbb   :  { %283 = vst [vmem:[#allocation8] sm:$0xff] %v282_v53 }
  0xbc   :  { %305 = dma.vmem_to_hbm [thread:$0]  %s301_s30, 128, %s303_s6, [#allocation9]  }
  0xbd   :  { %452 = dma.done.wait [#allocation4], 128  }
  0xbe   :  { %453 = vsyncadd [#allocation4], 4294967168 }
  0xbf   :  { %454 = dma.done.wait [#allocation9], 128  }
  0xc0   :  { %455 = vsyncadd [#allocation9], 4294967168 }
  0xc1   :  { %314 = vsyncpa [#allocation3], 1 }
  0xc2   :  { %315 = vsyncpa [#allocation6], 1 }
  0xc3   :  { %316 = vsyncpa [#allocation4], 1 }
  0xc4   :  { %317 = vsyncpa [#allocation9], 1 }

</bundles_post_ra>
